<compile_context>
chip_gen: v7x
topology: tpu7x:2x2x1
jax: 0.10.0
libtpu: 0.0.40
codegen_flags: <defaults>
</compile_context>

<pallas_src>
import functools

import jax
import jax.numpy as jnp
from jax.experimental import pallas as pl
from jax.experimental.pallas import tpu as pltpu


def _poisson_loss_kernel(n_rows, coef_ref, recon_ref, nf_ref, beta_ref,
                         basis_ref, alpha_ref, gamma_ref, count_ref, lib_ref,
                         out_ref, acc_ref):
    i = pl.program_id(0)

    @pl.when(i == 0)
    def _():
        acc_ref[0] = 0.0

    tn = recon_ref.shape[0]
    # Validity mask for a ragged last tile: padded rows must not pollute sums.
    row_ids = i * tn + jax.lax.broadcasted_iota(jnp.int32, (tn, 1), 0)
    valid = row_ids < n_rows                                     # [TN, 1]

    # ---- feature reconstruction: per-row L2 norm --------------------------
    diff = recon_ref[...] - nf_ref[...]                          # [TN, F]
    row_norm = jnp.sqrt(jnp.sum(diff * diff, axis=1, keepdims=True))  # [TN, 1]

    # ---- Poisson deconvolution --------------------------------------------
    mm = jnp.dot(beta_ref[...], basis_ref[...],
                 preferred_element_type=jnp.float32)             # [TN, G] (MXU)
    mm_eps = mm + 1e-6
    alpha = alpha_ref[...]                                       # [TN, 1]
    gamma = gamma_ref[...]                                       # [1, G]

    # log_lam is needed elementwise for the count term (one EUP log / element)
    log_lam = jnp.log(mm_eps) + alpha + gamma                    # [TN, G]

    # exp(log_lam) == (mm+eps) * exp(gamma) * exp(alpha); keep the exps on the
    # small vectors and factor exp(alpha) (and library_size) out of the G-sum.
    lam_g = mm_eps * jnp.exp(gamma)                              # [TN, G]
    row_lam_sum = jnp.sum(lam_g, axis=1, keepdims=True) * jnp.exp(alpha)  # [TN,1]

    lib = lib_ref[...]                                           # [TN, 1]
    log_lib = jnp.log(lib + 1e-6)                                # [TN, 1]
    count_term = jnp.sum(count_ref[...] * (log_lib + log_lam),
                         axis=1, keepdims=True)                  # [TN, 1]
    row_inner = count_term - lib * row_lam_sum                   # [TN, 1]

    # total = (1/N) * sum_n (coef_fe * ||diff_n|| - inner_n)
    coef_fe = coef_ref[0, 0]
    partial = jnp.sum(jnp.where(valid, coef_fe * row_norm - row_inner, 0.0))
    acc_ref[0] += partial

    @pl.when(i == pl.num_programs(0) - 1)
    def _():
        out_ref[0, 0] = acc_ref[0] / jnp.float32(n_rows)


def _choose_tile_n(n, g, f, k):
    """Pick an N tile that keeps double-buffered inputs + [TN,G] temps well
    under the v7x scoped-VMEM budget."""
    per_row_bytes = 4 * (2 * (g + 2 * f + k + 2) + 3 * g)
    tn = int((12 * 1024 * 1024) // max(per_row_bytes, 1))
    tn = max(8, (min(tn, 512) // 8) * 8)
    if n <= tn:
        return n          # single tile; block == full array is always legal
    return tn


def poisson_loss(recon_node_features, node_features, beta, basis,
                 alpha, gamma, count_matrix, library_size, coef_fe):
    N, F = recon_node_features.shape
    K, G = basis.shape
    TN = _choose_tile_n(N, G, F, K)
    grid = (pl.cdiv(N, TN),)

    coef_arr = jnp.asarray(coef_fe, jnp.float32).reshape(1, 1)
    kernel = functools.partial(_poisson_loss_kernel, N)

    smem = pltpu.MemorySpace.SMEM
    in_specs = [
        pl.BlockSpec(memory_space=smem),                       # coef_fe scalar
        pl.BlockSpec((TN, F), lambda i: (i, 0)),               # recon
        pl.BlockSpec((TN, F), lambda i: (i, 0)),               # node_features
        pl.BlockSpec((TN, K), lambda i: (i, 0)),               # beta
        pl.BlockSpec((K, G), lambda i: (0, 0)),                # basis (resident)
        pl.BlockSpec((TN, 1), lambda i: (i, 0)),               # alpha
        pl.BlockSpec((1, G), lambda i: (0, 0)),                # gamma (resident)
        pl.BlockSpec((TN, G), lambda i: (i, 0)),               # count_matrix
        pl.BlockSpec((TN, 1), lambda i: (i, 0)),               # library_size
    ]

    out = pl.pallas_call(
        kernel,
        out_shape=jax.ShapeDtypeStruct((1, 1), jnp.float32),
        grid=grid,
        in_specs=in_specs,
        out_specs=pl.BlockSpec(memory_space=smem),
        scratch_shapes=[pltpu.SMEM((1,), jnp.float32)],
        compiler_params=pltpu.CompilerParams(
            dimension_semantics=("arbitrary",),   # reduction axis (scalar acc)
            vmem_limit_bytes=32 * 1024 * 1024,
        ),
    )(coef_arr, recon_node_features, node_features, beta, basis,
      alpha, gamma, count_matrix, library_size)
    return out[0, 0]


if __name__ == "__main__":
    key = jax.random.PRNGKey(0)
    N, F, K, G = 8, 128, 8, 128   # spots, node-feature dim, cell types, genes
    ks = jax.random.split(key, 7)

    # deterministic "module parameters" (synthetic, not loaded from disk)
    node_features = jax.random.normal(ks[0], (N, F), jnp.float32)
    basis = jax.nn.softplus(jax.random.normal(ks[1], (K, G), jnp.float32))
    count_matrix = jnp.floor(10.0 * jax.random.uniform(ks[2], (N, G), jnp.float32))
    library_size = jnp.sum(count_matrix, axis=1, keepdims=True)          # [N, 1]
    coef_fe = 0.5

    # forward-pass inputs
    recon_node_features = jax.random.normal(ks[3], (N, F), jnp.float32)
    beta = jax.nn.softmax(jax.random.normal(ks[4], (N, K), jnp.float32), axis=-1)
    alpha = 0.1 * jax.random.normal(ks[5], (N, 1), jnp.float32)
    gamma = 0.1 * jax.random.normal(ks[6], (1, G), jnp.float32)

    loss = poisson_loss(recon_node_features, node_features, beta, basis,
                        alpha, gamma, count_matrix, library_size, coef_fe)
    loss = jax.block_until_ready(loss)

    # pure-JAX reference (mirrors the PyTorch forward exactly)
    feat_ref = jnp.mean(jnp.sqrt(jnp.sum(
        (recon_node_features - node_features) ** 2, axis=1)))
    log_lam = jnp.log(beta @ basis + 1e-6) + alpha + gamma
    lam = jnp.exp(log_lam)
    decon_ref = -jnp.mean(jnp.sum(
        count_matrix * (jnp.log(library_size + 1e-6) + log_lam)
        - library_size * lam, axis=1))
    ref = decon_ref + coef_fe * feat_ref

    assert jnp.allclose(loss, ref, rtol=1e-4, atol=1e-4), (loss, ref)
    print("KERNEL_OK")
</pallas_src>

<mosaic_0001>
module attributes {stable_mosaic.version = 11 : i64} {
  func.func @_poisson_loss_kernel(%arg0: i32, %arg1: memref<1x1xf32, #tpu.memory_space<smem>>, %arg2: memref<8x128xf32, #tpu.memory_space<vmem>>, %arg3: memref<8x128xf32, #tpu.memory_space<vmem>>, %arg4: memref<8x8xf32, #tpu.memory_space<vmem>>, %arg5: memref<8x128xf32, #tpu.memory_space<vmem>>, %arg6: memref<8x1xf32, #tpu.memory_space<vmem>>, %arg7: memref<1x128xf32, #tpu.memory_space<vmem>>, %arg8: memref<8x128xf32, #tpu.memory_space<vmem>>, %arg9: memref<8x1xf32, #tpu.memory_space<vmem>>, %arg10: memref<1x1xf32, #tpu.memory_space<smem>>, %arg11: memref<1xf32, #tpu.memory_space<smem>>) attributes {dimension_semantics = [#tpu.dimension_semantics<arbitrary>], iteration_bounds = array<i64: 1>, scalar_prefetch = 0 : i64, scratch_operands = 1 : i64, tpu.core_type = #tpu.core_type<tc>, window_params = [{transform_indices = @transform_0, window_bounds = array<i64: 1, 1>}, {transform_indices = @transform_1, window_bounds = array<i64: 8, 128>}, {transform_indices = @transform_2, window_bounds = array<i64: 8, 128>}, {transform_indices = @transform_3, window_bounds = array<i64: 8, 8>}, {pipeline_mode = #tpu.pipeline_mode<synchronous>, transform_indices = @transform_4, window_bounds = array<i64: 8, 128>}, {transform_indices = @transform_5, window_bounds = array<i64: 8, 1>}, {pipeline_mode = #tpu.pipeline_mode<synchronous>, transform_indices = @transform_6, window_bounds = array<i64: 1, 128>}, {transform_indices = @transform_7, window_bounds = array<i64: 8, 128>}, {transform_indices = @transform_8, window_bounds = array<i64: 8, 1>}, {transform_indices = @transform_9, window_bounds = array<i64: 1, 1>}]} {
    %c0_i32 = arith.constant 0 : i32
    %0 = arith.cmpi eq, %arg0, %c0_i32 : i32
    %1 = arith.extui %0 : i1 to i32
    %c0_i32_0 = arith.constant 0 : i32
    %2 = arith.cmpi ne, %1, %c0_i32_0 : i32
    scf.if %2 {
      %cst_30 = arith.constant 0.000000e+00 : f32
      %c0_31 = arith.constant 0 : index
      %63 = memref.load %arg11[%c0_31] : memref<1xf32, #tpu.memory_space<smem>>
      memref.store %cst_30, %arg11[%c0_31] : memref<1xf32, #tpu.memory_space<smem>>
    } else {
    }
    %c8_i32 = arith.constant 8 : i32
    %3 = arith.muli %arg0, %c8_i32 : i32
    %4 = tpu.iota {dimensions = array<i32: 0>} : vector<8x1xi32>
    %5 = vector.broadcast %3 : i32 to vector<8x1xi32>
    %6 = arith.addi %5, %4 : vector<8x1xi32>
    %c8_i32_1 = arith.constant 8 : i32
    %7 = vector.broadcast %c8_i32_1 : i32 to vector<8x1xi32>
    %8 = arith.cmpi slt, %6, %7 : vector<8x1xi32>
    %c0 = arith.constant 0 : index
    %c0_2 = arith.constant 0 : index
    %9 = vector.load %arg2[%c0, %c0_2] : memref<8x128xf32, #tpu.memory_space<vmem>>, vector<8x128xf32>
    %c0_3 = arith.constant 0 : index
    %c0_4 = arith.constant 0 : index
    %10 = vector.load %arg3[%c0_3, %c0_4] : memref<8x128xf32, #tpu.memory_space<vmem>>, vector<8x128xf32>
    %11 = arith.subf %9, %10 : vector<8x128xf32>
    %12 = arith.mulf %11, %11 : vector<8x128xf32>
    %cst = arith.constant dense<0.000000e+00> : vector<8xf32>
    %13 = vector.multi_reduction <add>, %12, %cst [1] : vector<8x128xf32> to vector<8xf32>
    %14 = vector.shape_cast %13 : vector<8xf32> to vector<8x1xf32>
    %15 = math.sqrt %14 : vector<8x1xf32>
    %c0_5 = arith.constant 0 : index
    %c0_6 = arith.constant 0 : index
    %16 = vector.load %arg4[%c0_5, %c0_6] : memref<8x8xf32, #tpu.memory_space<vmem>>, vector<8x8xf32>
    %c0_7 = arith.constant 0 : index
    %c0_8 = arith.constant 0 : index
    %17 = vector.load %arg5[%c0_7, %c0_8] : memref<8x128xf32, #tpu.memory_space<vmem>>, vector<8x128xf32>
    %cst_9 = arith.constant dense<0.000000e+00> : vector<8x128xf32>
    %18 = tpu.matmul %16, %17, %cst_9 {dimension_numbers = #tpu.dot_dimension_numbers<[1], [0], [0], [1], [0, 0, 1, 1], [], []>} : vector<8x8xf32>, vector<8x128xf32>, vector<8x128xf32> -> vector<8x128xf32>
    %cst_10 = arith.constant 9.99999997E-7 : f32
    %19 = vector.broadcast %cst_10 : f32 to vector<8x128xf32>
    %20 = arith.addf %18, %19 : vector<8x128xf32>
    %c0_11 = arith.constant 0 : index
    %c0_12 = arith.constant 0 : index
    %21 = vector.load %arg6[%c0_11, %c0_12] : memref<8x1xf32, #tpu.memory_space<vmem>>, vector<8x1xf32>
    %c0_13 = arith.constant 0 : index
    %c0_14 = arith.constant 0 : index
    %22 = vector.load %arg7[%c0_13, %c0_14] : memref<1x128xf32, #tpu.memory_space<vmem>>, vector<1x128xf32>
    %23 = math.log %20 : vector<8x128xf32>
    %24 = vector.broadcast %21 : vector<8x1xf32> to vector<8x128xf32>
    %25 = arith.addf %23, %24 : vector<8x128xf32>
    %26 = vector.broadcast %22 : vector<1x128xf32> to vector<8x128xf32>
    %27 = arith.addf %25, %26 : vector<8x128xf32>
    %28 = math.exp %22 : vector<1x128xf32>
    %29 = vector.broadcast %28 : vector<1x128xf32> to vector<8x128xf32>
    %30 = arith.mulf %20, %29 : vector<8x128xf32>
    %cst_15 = arith.constant dense<0.000000e+00> : vector<8xf32>
    %31 = vector.multi_reduction <add>, %30, %cst_15 [1] : vector<8x128xf32> to vector<8xf32>
    %32 = vector.shape_cast %31 : vector<8xf32> to vector<8x1xf32>
    %33 = math.exp %21 : vector<8x1xf32>
    %34 = arith.mulf %32, %33 : vector<8x1xf32>
    %c0_16 = arith.constant 0 : index
    %c0_17 = arith.constant 0 : index
    %35 = vector.load %arg9[%c0_16, %c0_17] : memref<8x1xf32, #tpu.memory_space<vmem>>, vector<8x1xf32>
    %cst_18 = arith.constant 9.99999997E-7 : f32
    %36 = vector.broadcast %cst_18 : f32 to vector<8x1xf32>
    %37 = arith.addf %35, %36 : vector<8x1xf32>
    %38 = math.log %37 : vector<8x1xf32>
    %c0_19 = arith.constant 0 : index
    %c0_20 = arith.constant 0 : index
    %39 = vector.load %arg8[%c0_19, %c0_20] : memref<8x128xf32, #tpu.memory_space<vmem>>, vector<8x128xf32>
    %40 = vector.broadcast %38 : vector<8x1xf32> to vector<8x128xf32>
    %41 = arith.addf %40, %27 : vector<8x128xf32>
    %42 = arith.mulf %39, %41 : vector<8x128xf32>
    %cst_21 = arith.constant dense<0.000000e+00> : vector<8xf32>
    %43 = vector.multi_reduction <add>, %42, %cst_21 [1] : vector<8x128xf32> to vector<8xf32>
    %44 = vector.shape_cast %43 : vector<8xf32> to vector<8x1xf32>
    %45 = arith.mulf %35, %34 : vector<8x1xf32>
    %46 = arith.subf %44, %45 : vector<8x1xf32>
    %c0_22 = arith.constant 0 : index
    %c0_23 = arith.constant 0 : index
    %47 = memref.load %arg1[%c0_22, %c0_23] : memref<1x1xf32, #tpu.memory_space<smem>>
    %48 = vector.broadcast %47 : f32 to vector<8x1xf32>
    %49 = arith.mulf %48, %15 : vector<8x1xf32>
    %50 = arith.subf %49, %46 : vector<8x1xf32>
    %cst_24 = arith.constant 0.000000e+00 : f32
    %51 = vector.broadcast %cst_24 : f32 to vector<8x1xf32>
    %52 = arith.select %8, %50, %51 : vector<8x1xi1>, vector<8x1xf32>
    %53 = vector.shape_cast %52 : vector<8x1xf32> to vector<1x8x1xf32>
    %cst_25 = arith.constant dense<0.000000e+00> : vector<1xf32>
    %54 = vector.multi_reduction <add>, %53, %cst_25 [1, 2] : vector<1x8x1xf32> to vector<1xf32>
    %55 = vector.shape_cast %54 : vector<1xf32> to vector<1x1x1xf32>
    %56 = vector.extract %55[0, 0, 0] : f32 from vector<1x1x1xf32>
    %c0_26 = arith.constant 0 : index
    %57 = memref.load %arg11[%c0_26] : memref<1xf32, #tpu.memory_space<smem>>
    %58 = arith.addf %57, %56 : f32
    %c0_27 = arith.constant 0 : index
    %59 = memref.load %arg11[%c0_27] : memref<1xf32, #tpu.memory_space<smem>>
    memref.store %58, %arg11[%c0_27] : memref<1xf32, #tpu.memory_space<smem>>
    %c0_i32_28 = arith.constant 0 : i32
    %60 = arith.cmpi eq, %arg0, %c0_i32_28 : i32
    %61 = arith.extui %60 : i1 to i32
    %c0_i32_29 = arith.constant 0 : i32
    %62 = arith.cmpi ne, %61, %c0_i32_29 : i32
    scf.if %62 {
      %c0_30 = arith.constant 0 : index
      %63 = memref.load %arg11[%c0_30] : memref<1xf32, #tpu.memory_space<smem>>
      %cst_31 = arith.constant 8.000000e+00 : f32
      %64 = arith.divf %63, %cst_31 : f32
      %c0_32 = arith.constant 0 : index
      %c0_33 = arith.constant 0 : index
      %65 = memref.load %arg10[%c0_32, %c0_33] : memref<1x1xf32, #tpu.memory_space<smem>>
      memref.store %64, %arg10[%c0_32, %c0_33] : memref<1x1xf32, #tpu.memory_space<smem>>
    } else {
    }
    return
  }
  func.func @transform_0(%arg0: i32) -> (i32, i32) {
    %c0_i32 = arith.constant 0 : i32
    %c0_i32_0 = arith.constant 0 : i32
    %c0_i32_1 = arith.constant 0 : i32
    return %c0_i32, %c0_i32_0 : i32, i32
  }
  func.func @transform_1(%arg0: i32) -> (i32, i32) {
    %c0_i32 = arith.constant 0 : i32
    %c0_i32_0 = arith.constant 0 : i32
    return %arg0, %c0_i32 : i32, i32
  }
  func.func @transform_2(%arg0: i32) -> (i32, i32) {
    %c0_i32 = arith.constant 0 : i32
    %c0_i32_0 = arith.constant 0 : i32
    return %arg0, %c0_i32 : i32, i32
  }
  func.func @transform_3(%arg0: i32) -> (i32, i32) {
    %c0_i32 = arith.constant 0 : i32
    %c0_i32_0 = arith.constant 0 : i32
    return %arg0, %c0_i32 : i32, i32
  }
  func.func @transform_4(%arg0: i32) -> (i32, i32) {
    %c0_i32 = arith.constant 0 : i32
    %c0_i32_0 = arith.constant 0 : i32
    %c0_i32_1 = arith.constant 0 : i32
    return %c0_i32, %c0_i32_0 : i32, i32
  }
  func.func @transform_5(%arg0: i32) -> (i32, i32) {
    %c0_i32 = arith.constant 0 : i32
    %c0_i32_0 = arith.constant 0 : i32
    return %arg0, %c0_i32 : i32, i32
  }
  func.func @transform_6(%arg0: i32) -> (i32, i32) {
    %c0_i32 = arith.constant 0 : i32
    %c0_i32_0 = arith.constant 0 : i32
    %c0_i32_1 = arith.constant 0 : i32
    return %c0_i32, %c0_i32_0 : i32, i32
  }
  func.func @transform_7(%arg0: i32) -> (i32, i32) {
    %c0_i32 = arith.constant 0 : i32
    %c0_i32_0 = arith.constant 0 : i32
    return %arg0, %c0_i32 : i32, i32
  }
  func.func @transform_8(%arg0: i32) -> (i32, i32) {
    %c0_i32 = arith.constant 0 : i32
    %c0_i32_0 = arith.constant 0 : i32
    return %arg0, %c0_i32 : i32, i32
  }
  func.func @transform_9(%arg0: i32) -> (i32, i32) {
    %c0_i32 = arith.constant 0 : i32
    %c0_i32_0 = arith.constant 0 : i32
    %c0_i32_1 = arith.constant 0 : i32
    return %c0_i32, %c0_i32_0 : i32, i32
  }
}

</mosaic_0001>

<bundles_post_ra>
// kernel: tpu_custom_call.1
= control target key start
LH: loop header
LB: loop body
LE: loop exit
PB: predicated region body
PF: predicated region fallthrough
CT: control target
= control target key end

     0   :  { %15 = vsyncpa [#allocation5], 0  ;;  %s402_s0 = inlined_call_operand.<no memory space> [shape: f32[1,1], index: 0, kind: input, shape index: {}]   ;;  %s403_s1 = inlined_call_operand.vmem [shape: f32[8,128], index: 1, kind: input, shape index: {}]   ;;  %s404_s2 = inlined_call_operand.vmem [shape: f32[8,128], index: 2, kind: input, shape index: {}]   ;;  %s405_s3 = inlined_call_operand.vmem [shape: f32[8,8], index: 3, kind: input, shape index: {}]   ;;  %s406_s4 = inlined_call_operand.vmem [shape: f32[8,128], index: 4, kind: input, shape index: {}]   ;;  %s407_s5 = inlined_call_operand.vmem [shape: f32[8,1], index: 5, kind: input, shape index: {}]   ;;  %s408_s6 = inlined_call_operand.hbm [shape: f32[1,128], index: 6, kind: input, shape index: {}]   ;;  %s409_s7 = inlined_call_operand.vmem [shape: f32[8,128], index: 7, kind: input, shape index: {}]   ;;  %s410_s8 = inlined_call_operand.vmem [shape: f32[8,1], index: 8, kind: input, shape index: {}]   ;;  %s411_s9 = inlined_call_operand.hbm [shape: f32[1,1], index: 9, kind: output, shape index: {}]  }
   0x1   :  { %16 = vsyncpa [#allocation6], 0  ;;  %s299_s30 = smov [#allocation4]   ;;  %s263_s13 = scalar_lea.hbm %s408_s6, 16 }
   0x2   :  { %s35_s10 = sshll.u32 %s299_s30, 4  ;;  %p264_p0 = scmp.ne.s32.totalorder %s408_s6, %s263_s13  ;;  %s36_s10 = int_to_ptr.vmem [resolvable:$true] %s35_s10 }
   0x3   :  { %p267_p1 = scmp.lt.u32.totalorder %s263_s13, %s408_s6 }
   0x5   :  { %p269_p2 = pnand %p267_p1, %p264_p0 }
   0x7   :  { %272 = shalt.err (!%p269_p2)
}
   0x8   :  { %s273_s18 = scalar_lea.vmem %s36_s10, 16  ;;  %s277_s19 = scalar_lea.vmem %s36_s10, 32 }
   0x9   :  { %p274_p3 = scmp.ne.s32.totalorder %s36_s10, %s273_s18  ;;  %p278_p4 = scmp.lt.s32.totalorder %s36_s10, %s36_s10 }
   0xa   :  { %p279_p5 = scmp.lt.s32.totalorder %s277_s19, %s273_s18 }
   0xc   :  { %p280_p6 = por %p279_p5, %p278_p4 }
   0xe   :  { %p281_p7 = pnand %p280_p6, %p274_p3 }
  0x10   :  { %284 = shalt.err (!%p281_p7)
}
  0x11   :  { %38 = dma.hbm_to_vmem [thread:$0]  %s408_s6, 16, %s36_s10, [#allocation5]  }
  0x12   :  { %295 = dma.done.wait [#allocation5], 16  }
  0x13   :  { %296 = vsyncadd [#allocation5], 4294967280  ;;  %v300_v0 = vmov 0.0   ;;  %vm301_vm0 = vmmov 0   ;;  %v302_v1 = vmov 0   ;;  %vm73_vm1 = vcmask 64512  }
  0x14   :  { %240 = vmatprep.subr.mxu0 %v300_v0  ;;  %242 = vmatprep.mubr.msk.f32.mxu0 %vm301_vm0, %v300_v0  ;;  %v72_v2 = vld [vmem:[%s406_s4] sm:$0xff]  ;;  %v158_v15 = vlaneseq  ;;  %v195_v44 = vstv %s402_s0  ;;  %vm199_vm4 = vcmask 7168   ;;  %s285_s12 = scalar_lea.hbm %s411_s9, 16 }
  0x15   :  { %252 = vset.pattern.permute.xlu0 %v302_v1  ;;  %v71_v3 = vld [vmem:[%s405_s3] sm:$0xff]  ;;  %241 = vmatpush3.msra.mxu0 %v72_v2  ;;  %p286_p8 = scmp.ne.s32.totalorder %s411_s9, %s285_s12  ;;  %p289_p9 = scmp.lt.u32.totalorder %s285_s12, %s411_s9 }
  0x16   :  { %v147_v4 = vld [vmem:[%s407_s5] sm:$0xff]  ;;  %243 = vmatmul.mubr.msk.f32.vlgmr.msra.gmra.mrb[0].mxu0 %vm73_vm1, %v71_v3  ;;  %v159_v16 = vshrl.u32 %v158_v15, 7 }
  0x17   :  { %153 = vperm.xlu0 %252, %v147_v4   ;;  %v178_v5 = vld [vmem:[%s410_s8] sm:$0xff]  ;;  %v175_v35 = vmul.f32 1.442695, %v147_v4  ;;  %p291_p10 = pnand %p289_p9, %p286_p8 }
  0x18   :  { %v58_v6 = vld [vmem:[%s403_s1] sm:$0xff]  ;;  %v179_v8 = vadd.f32 1e-06, %v178_v5  ;;  %v160_v17 = vsub.s32 0, %v159_v16 }
  0x19   :  { %v59_v7 = vld [vmem:[%s404_s2] sm:$0xff] }
  0x1a   :  { %v60_v9 = vsub.f32 %v58_v6, %v59_v7  ;;  %253 = vlog2.f32 %v179_v8  ;;  %v148_v13 = vld [vmem:[#allocation4] sm:$0x1] }
  0x1b   :  { %v164_v14 = vmul.f32 1.442695, %v148_v13  ;;  %v161_v27 = vrot.slane %v148_v13, %v160_v17  ;;  %v182_v31 = vld [vmem:[%s409_s7] sm:$0xff] }
  0x1c   :  { %v61_v10 = vmul.f32 %v60_v9, %v60_v9 }
  0x1d   :  { %255 = vpow2.f32 %v164_v14 }
  0x1e   :  { %62 = vadd.xlane.f32.xlu1 %v61_v10 }
  0x24   :  { %v254_v11 = vpop.eup %253 }
  0x25   :  { %v181_v12 = vmul.f32 0.6931472, %v254_v11 }
  0x27   :  { %185 = vperm.xlu0 %252, %v181_v12   ;;  %v256_v18 = vpop.eup %255 }
  0x28   :  { %v170_v19 = vrot.slane %v256_v18, %v160_v17 }
  0x96   :  { %v154_v25 = vpop.permute.xlu0 %153 }
  0xa6   :  { %v186_v30 = vpop.permute.xlu0 %185 }
  0xab   :  { %v63_v34 = vpop.xlane.xlu1 %62 }
  0xac   :  { %vm66_vm2 = vcmp.eq.f32.partialorder %v63_v34, inf  ;;  %v69_v40 = vand.u32 2147483648, %v63_v34  ;;  %vm68_vm3 = vcmp.eq.f32.partialorder %v63_v34, 0.0 }
  0xe9   :  { %v143_v20 = vpop.f32.mrb[0].mxu0 }
  0xea   :  { %v144_v21 = vadd.f32 1e-06, %v143_v20  ;;  %v244_v22 = vpop.f32.mrb[1].mxu0 }
  0xec   :  { %257 = vlog2.f32 %v144_v21  ;;  %v172_v23 = vmul.f32 %v170_v19, %v144_v21 }
  0xed   :  { %259 = vrsqrt.f32 %v63_v34 }
  0xee   :  { %173 = vadd.xlane.f32.xlu1 %v172_v23  ;;  %261 = vpow2.f32 %v175_v35 }
  0xf6   :  { %v258_v24 = vpop.eup %257 }
  0xf7   :  { %v150_v26 = vmul.f32 0.6931472, %v258_v24  ;;  %v260_v36 = vpop.eup %259 }
  0xf8   :  { %v65_v37 = vmul.f32 %v260_v36, %v63_v34  ;;  %v262_v38 = vpop.eup %261 }
  0xf9   :  { %v156_v28 = vadd.f32 %v154_v25, %v150_v26 }
  0xfa   :  { %v67_v42 = vsel %vm66_vm2, %v63_v34, %v65_v37 }
  0xfb   :  { %v163_v29 = vadd.f32 %v161_v27, %v156_v28  ;;  %v70_v43 = vsel %vm68_vm3, %v69_v40, %v67_v42 }
  0xfc   :  { %v196_v48 = vmul.f32 %v195_v44, %v70_v43 }
  0xfd   :  { %v188_v32 = vadd.f32 %v186_v30, %v163_v29 }
  0xff   :  { %v189_v33 = vmul.f32 %v188_v32, %v182_v31 }
 0x101   :  { %190 = vadd.xlane.f32.xlu0 %v189_v33 }
 0x17b   :  { %v174_v39 = vpop.xlane.xlu1 %173 }
 0x17c   :  { %v177_v41 = vmul.f32 %v262_v38, %v174_v39 }
 0x17e   :  { %v192_v45 = vmul.f32 %v178_v5, %v177_v41 }
 0x18e   :  { %v191_v46 = vpop.xlane.xlu0 %190 }
 0x18f   :  { %v193_v47 = vsub.f32 %v191_v46, %v192_v45 }
 0x191   :  { %v197_v49 = vsub.f32 %v196_v48, %v193_v47 }
 0x193   :  { %v200_v50 = vsel %vm199_vm4, %v197_v49, 0.0 }
 0x194   :  { %201 = vadd.xlane.f32.xlu1 %v200_v50 }
 0x221   :  { %v202_v51 = vpop.xlane.xlu1 %201 }
 0x222   :  { %v203_v52 = vrot.slane %v202_v51, 4 }
 0x224   :  { %v204_v53 = vadd.f32 %v203_v52, %v202_v51 }
 0x226   :  { %v205_v54 = vrot.slane %v204_v53, 2 }
 0x228   :  { %v206_v55 = vadd.f32 %v205_v54, %v204_v53 }
 0x22a   :  { %v207_v56 = vrot.slane %v206_v55, 1 }
 0x22c   :  { %v208_v57 = vadd.f32 %v207_v56, %v206_v55 }
 0x22e   :  { %245 = vpush %v208_v57 }
 0x25f   :  { %s246_s7 = spop %245 }
 0x260   :  { %s220_s8 = smul.f32 0.125, %s246_s7 }
 0x262   :  { %222 = sst [smem:[#allocation7]] %s220_s8 }
 0x263   :  { %294 = shalt.err (!%p291_p10)
}
 0x264   :  { %s303_s17 = smov [#allocation7]  }
 0x265   :  { %230 = dma.smem_to_hbm %s303_s17, 16, %s411_s9, [#allocation6]  }
 0x266   :  { %297 = dma.done.wait [#allocation6], 16  }
 0x267   :  { %298 = vsyncadd [#allocation6], 4294967280 }
 0x268   :  { %234 = sfence }
 0x269   :  { %235 = vsyncpa [#allocation5], 1 }
 0x26a   :  { %236 = vsyncpa [#allocation6], 1 }

</bundles_post_ra>
